<compile_context>
chip_gen: v5e
topology: v5e:2x2
jax: 0.10.0
libtpu: 0.0.40
codegen_flags: <defaults>
</compile_context>

<pallas_src>
import functools

import jax
import jax.numpy as jnp
from jax import lax
from jax.experimental import pallas as pl
from jax.experimental.pallas import tpu as pltpu


_VMEM_LIMIT = 32 * 1024 * 1024  # <= physical VMEM on v5e/v6e (128 MiB) and v7x (64 MiB)


def _round_up(x, m):
    return ((x + m - 1) // m) * m


def _pick_tile(dim, preferred, align):
    """Largest multiple of `align` that divides `dim` and is <= preferred.

    Falls back to the full dim (always a legal block: equals the array extent).
    Callers budget VMEM for the fallback case (see the assert in pallas_attention).
    """
    if dim <= preferred:
        return dim
    t = (preferred // align) * align
    while t >= align:
        if dim % t == 0:
            return t
        t -= align
    return dim


# ---------------------------------------------------------------------------
# Tiled matmul kernel (shared by the qkv projection and the output projection).
#   y = x @ w + b, f32 accumulator in VMEM, init/finalize gated on the reduction
#   grid axis (`k_axis`).
# ---------------------------------------------------------------------------
def _matmul_kernel(x_ref, w_ref, b_ref, o_ref, acc_ref, *, k_axis):
    @pl.when(pl.program_id(k_axis) == 0)
    def _():
        acc_ref[...] = jnp.zeros(acc_ref.shape, jnp.float32)

    acc_ref[...] += jnp.dot(x_ref[...], w_ref[...],
                            preferred_element_type=jnp.float32)

    @pl.when(pl.program_id(k_axis) == pl.num_programs(k_axis) - 1)
    def _():
        o_ref[...] = (acc_ref[...] + b_ref[...]).astype(o_ref.dtype)


def pallas_linear(x, w, b, *, out_dtype=None,
                  tm_pref=1024, tn_pref=768, tk_pref=512):
    """y = x @ w + b.  x: (M, K) bf16, w: (K, N) bf16 (pre-transposed vs torch),
    b: (N,) f32.  f32 accumulation; output dtype defaults to x.dtype."""
    if out_dtype is None:
        out_dtype = x.dtype
    M, K = x.shape
    K2, N = w.shape
    assert K == K2
    tm = min(tm_pref, _round_up(M, 8))
    Mp = _round_up(M, tm)
    if Mp != M:
        x = jnp.pad(x, ((0, Mp - M), (0, 0)))
    tn = _pick_tile(N, tn_pref, 128)
    tk = _pick_tile(K, tk_pref, 128)
    grid = (Mp // tm, N // tn, K // tk)
    out = pl.pallas_call(
        functools.partial(_matmul_kernel, k_axis=2),
        out_shape=jax.ShapeDtypeStruct((Mp, N), out_dtype),
        grid_spec=pltpu.PrefetchScalarGridSpec(
            num_scalar_prefetch=0,
            grid=grid,
            in_specs=[
                pl.BlockSpec((tm, tk), lambda i, j, k: (i, k)),
                pl.BlockSpec((tk, tn), lambda i, j, k: (k, j)),
                pl.BlockSpec((1, tn), lambda i, j, k: (0, j)),
            ],
            out_specs=pl.BlockSpec((tm, tn), lambda i, j, k: (i, j)),
            scratch_shapes=[pltpu.VMEM((tm, tn), jnp.float32)],
        ),
        compiler_params=pltpu.CompilerParams(
            dimension_semantics=("parallel", "parallel", "arbitrary"),
            vmem_limit_bytes=_VMEM_LIMIT),
    )(x, w, b.reshape(1, N).astype(jnp.float32))
    return out[:M] if Mp != M else out


def pallas_qkv_linear(x, w3, b3, *, out_dtype,
                      tm_pref=1024, tn_pref=768, tk_pref=512):
    """qkv projection writing q/k/v to separate slabs: out[s] = x @ w3[s] + b3[s].

    x: (M, K) bf16, w3: (3, K, C) bf16, b3: (3, 1, C) f32  ->  (3, M, C).
    The slab layout lets the attention kernel stream q/k/v independently
    (no over-fetch of the 3C-wide activation)."""
    M, K = x.shape
    s3, K2, N = w3.shape
    assert s3 == 3 and K == K2
    tm = min(tm_pref, _round_up(M, 8))
    Mp = _round_up(M, tm)
    if Mp != M:
        x = jnp.pad(x, ((0, Mp - M), (0, 0)))
    tn = _pick_tile(N, tn_pref, 128)
    tk = _pick_tile(K, tk_pref, 128)
    grid = (3, Mp // tm, N // tn, K // tk)
    out = pl.pallas_call(
        functools.partial(_matmul_kernel, k_axis=3),
        out_shape=jax.ShapeDtypeStruct((3, Mp, N), out_dtype),
        grid_spec=pltpu.PrefetchScalarGridSpec(
            num_scalar_prefetch=0,
            grid=grid,
            in_specs=[
                pl.BlockSpec((tm, tk), lambda s, i, j, k: (i, k)),
                pl.BlockSpec((None, tk, tn), lambda s, i, j, k: (s, k, j)),
                pl.BlockSpec((None, 1, tn), lambda s, i, j, k: (s, 0, j)),
            ],
            out_specs=pl.BlockSpec((None, tm, tn), lambda s, i, j, k: (s, i, j)),
            scratch_shapes=[pltpu.VMEM((tm, tn), jnp.float32)],
        ),
        compiler_params=pltpu.CompilerParams(
            dimension_semantics=("parallel", "parallel", "parallel", "arbitrary"),
            vmem_limit_bytes=_VMEM_LIMIT),
    )(x, w3, b3.astype(jnp.float32))
    return out[:, :M] if Mp != M else out


# ---------------------------------------------------------------------------
# Fused flash-style multi-head attention kernel.
#   q_ref : (tq, C)   bf16, q already scaled (scale folded into qkv weights)
#   k_ref : (tkv, C)  bf16
#   v_ref : (tkv, C)  bf16
#   o_ref : (tq, C)   lane-dense output, column layout [nh, hd]
# Online-softmax statistics m/l are (tq, nh) f32 scratch; the accumulator is a
# (tq, C) f32 scratch updated with one lane-dense store per kv step.
# ---------------------------------------------------------------------------
def _flash_attention_kernel(q_ref, k_ref, v_ref, o_ref, m_ref, l_ref, acc_ref,
                            *, num_heads, head_dim):
    ki = pl.program_id(2)
    tq = q_ref.shape[0]

    @pl.when(ki == 0)
    def _():
        m_ref[...] = jnp.full(m_ref.shape, -jnp.inf, jnp.float32)
        l_ref[...] = jnp.zeros(l_ref.shape, jnp.float32)
        acc_ref[...] = jnp.zeros(acc_ref.shape, jnp.float32)

    m_all = m_ref[...]          # (tq, nh) f32
    l_all = l_ref[...]          # (tq, nh) f32

    m_out, l_out, alpha_parts, pv_parts = [], [], [], []
    for h in range(num_heads):
        sl = slice(h * head_dim, (h + 1) * head_dim)
        q = q_ref[:, sl]                                     # (tq, hd)  bf16
        k = k_ref[:, sl]                                     # (tkv, hd) bf16
        v = v_ref[:, sl]                                     # (tkv, hd) bf16

        # scores = q @ k^T via last-axis contraction (no materialized transpose)
        s = lax.dot_general(q, k, (((1,), (1,)), ((), ())),
                            preferred_element_type=jnp.float32)  # (tq, tkv) f32

        m_prev = m_all[:, h:h + 1]                           # (tq, 1)
        m_new = jnp.maximum(m_prev, jnp.max(s, axis=-1, keepdims=True))
        alpha = jnp.exp(m_prev - m_new)                      # (tq, 1)
        p = jnp.exp(s - m_new)                               # (tq, tkv) f32
        l_new = alpha * l_all[:, h:h + 1] + jnp.sum(p, axis=-1, keepdims=True)

        pv = jnp.dot(p.astype(v.dtype), v,
                     preferred_element_type=jnp.float32)     # (tq, hd) f32

        m_out.append(m_new)
        l_out.append(l_new)
        alpha_parts.append(jnp.broadcast_to(alpha, (tq, head_dim)))
        pv_parts.append(pv)

    m_ref[...] = jnp.concatenate(m_out, axis=-1)
    l_cat = jnp.concatenate(l_out, axis=-1)
    l_ref[...] = l_cat

    # One lane-dense (tq, C) accumulator update per kv step (no per-head
    # half-vreg masked read-modify-writes in the hot loop).
    alpha_full = jnp.concatenate(alpha_parts, axis=-1)       # (tq, C) f32
    pv_full = jnp.concatenate(pv_parts, axis=-1)             # (tq, C) f32
    acc_new = alpha_full * acc_ref[...] + pv_full
    acc_ref[...] = acc_new

    @pl.when(ki == pl.num_programs(2) - 1)
    def _():
        inv = 1.0 / l_cat                                    # exact; once per q tile
        inv_full = jnp.concatenate(
            [jnp.broadcast_to(inv[:, h:h + 1], (tq, head_dim))
             for h in range(num_heads)], axis=-1)            # (tq, C)
        o_ref[...] = (acc_new * inv_full).astype(o_ref.dtype)


def pallas_attention(qkv3, num_heads, head_dim, *, tq_pref=512, tkv_pref=512):
    """qkv3: (3, B, S, C) bf16 (q pre-scaled), C column layout [nh, hd] -> (B, S, C)."""
    s3, B, S, C = qkv3.shape
    assert s3 == 3 and C == num_heads * head_dim
    tq = _pick_tile(S, tq_pref, 8)
    tkv = _pick_tile(S, tkv_pref, 8)

    # Crude VMEM budget guard (double-buffered q/k/v/out blocks, f32 acc,
    # score/prob temporaries) against the _pick_tile full-dim fallback.
    itm = qkv3.dtype.itemsize
    est = (2 * (tq + 2 * tkv + tq) * C * itm    # double-buffered in/out blocks
           + 3 * tq * C * 4                     # acc + alpha/pv temporaries
           + 2 * tq * tkv * 4)                  # s/p temporaries
    assert est < _VMEM_LIMIT, (
        f"attention blocks too large for VMEM (S={S}, tq={tq}, tkv={tkv}); "
        "pad S to a tile multiple or lower tq_pref/tkv_pref")

    grid = (B, S // tq, S // tkv)

    q_spec = pl.BlockSpec((None, None, tq, C), lambda b, qi, ki: (0, b, qi, 0))
    k_spec = pl.BlockSpec((None, None, tkv, C), lambda b, qi, ki: (1, b, ki, 0))
    v_spec = pl.BlockSpec((None, None, tkv, C), lambda b, qi, ki: (2, b, ki, 0))
    o_spec = pl.BlockSpec((None, tq, C), lambda b, qi, ki: (b, qi, 0))

    return pl.pallas_call(
        functools.partial(_flash_attention_kernel,
                          num_heads=num_heads, head_dim=head_dim),
        out_shape=jax.ShapeDtypeStruct((B, S, C), qkv3.dtype),
        grid_spec=pltpu.PrefetchScalarGridSpec(
            num_scalar_prefetch=0,
            grid=grid,
            in_specs=[q_spec, k_spec, v_spec],
            out_specs=o_spec,
            scratch_shapes=[
                pltpu.VMEM((tq, num_heads), jnp.float32),   # running max m
                pltpu.VMEM((tq, num_heads), jnp.float32),   # running sum l
                pltpu.VMEM((tq, C), jnp.float32),           # output accumulator
            ],
        ),
        compiler_params=pltpu.CompilerParams(
            dimension_semantics=("parallel", "parallel", "arbitrary"),
            vmem_limit_bytes=_VMEM_LIMIT),
    )(qkv3, qkv3, qkv3)


# ---------------------------------------------------------------------------
# Forward pass (matches Attention.forward with use_rel_pos=False)
# ---------------------------------------------------------------------------
def attention_forward(x, params, num_heads):
    """x: (B, H, W, C) float32 -> (B, H, W, C) float32."""
    B, H, W, C = x.shape
    head_dim = C // num_heads
    scale = head_dim ** (-0.5)
    S = H * W
    M = B * S

    xf = x.reshape(M, C).astype(jnp.bfloat16)

    # Fold the attention scale into the q slab of the qkv projection (free).
    slab_scale = jnp.array([scale, 1.0, 1.0], jnp.float32)
    w3 = (params["qkv_w"] * slab_scale[:, None, None]).astype(jnp.bfloat16)
    b3 = (params["qkv_b"] * slab_scale[:, None]).reshape(3, 1, C)

    # qkv projection -> (3, M, C): q/k/v land in separate slabs.
    qkv = pallas_qkv_linear(xf, w3, b3, out_dtype=jnp.bfloat16)
    qkv3 = qkv.reshape(3, B, S, C)            # free reshape

    # Fused flash attention over all heads; output columns already laid out as
    # [nh, hd], so the permute back to (B, H, W, C) is a free reshape.
    o = pallas_attention(qkv3, num_heads, head_dim)

    out = pallas_linear(o.reshape(M, C),
                        params["proj_w"].astype(jnp.bfloat16),
                        params["proj_b"], out_dtype=jnp.float32)
    return out.reshape(B, H, W, C)


def init_params(key, dim):
    # qkv_w: (3, in, out) == torch qkv.weight.reshape(3, dim, dim).swapaxes(1, 2)
    # qkv_b: (3, dim)     == torch qkv.bias.reshape(3, dim)
    # proj_w: (in, out)   == torch proj.weight.T
    k1, k2, k3, k4 = jax.random.split(key, 4)
    lim = 1.0 / (dim ** 0.5)
    return {
        "qkv_w": jax.random.uniform(k1, (3, dim, dim), jnp.float32, -lim, lim),
        "qkv_b": jax.random.uniform(k2, (3, dim), jnp.float32, -lim, lim),
        "proj_w": jax.random.uniform(k3, (dim, dim), jnp.float32, -lim, lim),
        "proj_b": jax.random.uniform(k4, (dim,), jnp.float32, -lim, lim),
    }


def attention_reference(x, params, num_heads):
    """Pure-JAX f32 reference mirroring the torch module."""
    B, H, W, C = x.shape
    S = H * W
    hd = C // num_heads
    scale = hd ** (-0.5)
    xf = x.reshape(B, S, C)
    q = xf @ params["qkv_w"][0] + params["qkv_b"][0]
    k = xf @ params["qkv_w"][1] + params["qkv_b"][1]
    v = xf @ params["qkv_w"][2] + params["qkv_b"][2]

    def split(t):
        return t.reshape(B, S, num_heads, hd).transpose(0, 2, 1, 3)

    q, k, v = split(q), split(k), split(v)
    attn = jax.nn.softmax((q * scale) @ jnp.swapaxes(k, -2, -1), axis=-1)
    o = (attn @ v).transpose(0, 2, 1, 3).reshape(B, S, C)
    out = o @ params["proj_w"] + params["proj_b"]
    return out.reshape(B, H, W, C)


if __name__ == "__main__":
    B, H, W, dim = 2, 8, 8, 32
    num_heads = 4  # head_dim = 8

    key = jax.random.PRNGKey(0)
    kx, kp = jax.random.split(key)
    x = jax.random.normal(kx, (B, H, W, dim), jnp.float32)
    params = init_params(kp, dim)

    out = attention_forward(x, params, num_heads)
    jax.block_until_ready(out)
    assert out.shape == (B, H, W, dim)
    assert out.dtype == jnp.float32

    ref = attention_reference(x, params, num_heads)
    err = float(jnp.max(jnp.abs(out - ref)))
    assert err < 1e-1, f"max abs error vs f32 reference too large: {err}"
    print("KERNEL_OK")
</pallas_src>

<mosaic_0001>
module attributes {stable_mosaic.version = 11 : i64} {
  func.func @_matmul_kernel(%arg0: i32, %arg1: i32, %arg2: i32, %arg3: i32, %arg4: memref<128x32xbf16, #tpu.memory_space<vmem>>, %arg5: memref<1x32x32xbf16, #tpu.memory_space<vmem>>, %arg6: memref<1x1x32xf32, #tpu.memory_space<vmem>>, %arg7: memref<1x128x32xbf16, #tpu.memory_space<vmem>>, %arg8: memref<128x32xf32, #tpu.memory_space<vmem>>) attributes {dimension_semantics = [#tpu.dimension_semantics<parallel>, #tpu.dimension_semantics<parallel>, #tpu.dimension_semantics<parallel>, #tpu.dimension_semantics<arbitrary>], iteration_bounds = array<i64: 3, 1, 1, 1>, scalar_prefetch = 0 : i64, scratch_operands = 1 : i64, tpu.core_type = #tpu.core_type<tc>, window_params = [{transform_indices = @transform_0, window_bounds = array<i64: 128, 32>}, {transform_indices = @transform_1, window_bounds = array<i64: 1, 32, 32>}, {transform_indices = @transform_2, window_bounds = array<i64: 1, 1, 32>}, {transform_indices = @transform_3, window_bounds = array<i64: 1, 128, 32>}]} {
    %c0_i32 = arith.constant 0 : i32
    %0 = arith.cmpi eq, %arg3, %c0_i32 : i32
    %1 = arith.extui %0 : i1 to i32
    %c0_i32_0 = arith.constant 0 : i32
    %2 = arith.cmpi ne, %1, %c0_i32_0 : i32
    scf.if %2 {
      %cst_11 = arith.constant 0.000000e+00 : f32
      %13 = vector.broadcast %cst_11 : f32 to vector<128x32xf32>
      %c0_12 = arith.constant 0 : index
      %c0_13 = arith.constant 0 : index
      %14 = vector.load %arg8[%c0_12, %c0_13] : memref<128x32xf32, #tpu.memory_space<vmem>>, vector<128x32xf32>
      tpu.vector_store %arg8[%c0_12, %c0_13], %13 {strides = array<i32>} : memref<128x32xf32, #tpu.memory_space<vmem>>, vector<128x32xf32>,
    } else {
    }
    %c0 = arith.constant 0 : index
    %c0_1 = arith.constant 0 : index
    %3 = vector.load %arg8[%c0, %c0_1] : memref<128x32xf32, #tpu.memory_space<vmem>>, vector<128x32xf32>
    %c0_2 = arith.constant 0 : index
    %c0_3 = arith.constant 0 : index
    %4 = vector.load %arg4[%c0_2, %c0_3] : memref<128x32xbf16, #tpu.memory_space<vmem>>, vector<128x32xbf16>
    %c0_4 = arith.constant 0 : index
    %c0_5 = arith.constant 0 : index
    %c0_6 = arith.constant 0 : index
    %5 = vector.load %arg5[%c0_4, %c0_5, %c0_6] : memref<1x32x32xbf16, #tpu.memory_space<vmem>>, vector<1x32x32xbf16>
    %6 = vector.shape_cast %5 : vector<1x32x32xbf16> to vector<32x32xbf16>
    %cst = arith.constant dense<0.000000e+00> : vector<128x32xf32>
    %7 = tpu.matmul %4, %6, %cst {dimension_numbers = #tpu.dot_dimension_numbers<[1], [0], [0], [1], [0, 0, 1, 1], [], []>} : vector<128x32xbf16>, vector<32x32xbf16>, vector<128x32xf32> -> vector<128x32xf32>
    %8 = arith.addf %3, %7 : vector<128x32xf32>
    %c0_7 = arith.constant 0 : index
    %c0_8 = arith.constant 0 : index
    %9 = vector.load %arg8[%c0_7, %c0_8] : memref<128x32xf32, #tpu.memory_space<vmem>>, vector<128x32xf32>
    tpu.vector_store %arg8[%c0_7, %c0_8], %8 {strides = array<i32>} : memref<128x32xf32, #tpu.memory_space<vmem>>, vector<128x32xf32>,
    %c0_i32_9 = arith.constant 0 : i32
    %10 = arith.cmpi eq, %arg3, %c0_i32_9 : i32
    %11 = arith.extui %10 : i1 to i32
    %c0_i32_10 = arith.constant 0 : i32
    %12 = arith.cmpi ne, %11, %c0_i32_10 : i32
    scf.if %12 {
      %c0_11 = arith.constant 0 : index
      %c0_12 = arith.constant 0 : index
      %13 = vector.load %arg8[%c0_11, %c0_12] : memref<128x32xf32, #tpu.memory_space<vmem>>, vector<128x32xf32>
      %c0_13 = arith.constant 0 : index
      %c0_14 = arith.constant 0 : index
      %c0_15 = arith.constant 0 : index
      %14 = vector.load %arg6[%c0_13, %c0_14, %c0_15] : memref<1x1x32xf32, #tpu.memory_space<vmem>>, vector<1x1x32xf32>
      %15 = vector.shape_cast %14 : vector<1x1x32xf32> to vector<1x32xf32>
      %16 = vector.broadcast %15 : vector<1x32xf32> to vector<128x32xf32>
      %17 = arith.addf %13, %16 : vector<128x32xf32>
      %18 = arith.truncf %17 : vector<128x32xf32> to vector<128x32xbf16>
      %c0_16 = arith.constant 0 : index
      %c0_17 = arith.constant 0 : index
      %c0_18 = arith.constant 0 : index
      %19 = vector.load %arg7[%c0_16, %c0_17, %c0_18] : memref<1x128x32xbf16, #tpu.memory_space<vmem>>, vector<1x128x32xbf16>
      %20 = vector.shape_cast %19 : vector<1x128x32xbf16> to vector<128x32xbf16>
      %21 = vector.shape_cast %18 : vector<128x32xbf16> to vector<1x128x32xbf16>
      tpu.vector_store %arg7[%c0_16, %c0_17, %c0_18], %21 {strides = array<i32>} : memref<1x128x32xbf16, #tpu.memory_space<vmem>>, vector<1x128x32xbf16>,
    } else {
    }
    return
  }
  func.func @transform_0(%arg0: i32, %arg1: i32, %arg2: i32, %arg3: i32) -> (i32, i32) {
    %c0_i32 = arith.constant 0 : i32
    return %arg1, %arg3 : i32, i32
  }
  func.func @transform_1(%arg0: i32, %arg1: i32, %arg2: i32, %arg3: i32) -> (i32, i32, i32) {
    %c0_i32 = arith.constant 0 : i32
    return %arg0, %arg3, %arg2 : i32, i32, i32
  }
  func.func @transform_2(%arg0: i32, %arg1: i32, %arg2: i32, %arg3: i32) -> (i32, i32, i32) {
    %c0_i32 = arith.constant 0 : i32
    %c0_i32_0 = arith.constant 0 : i32
    return %arg0, %c0_i32, %arg2 : i32, i32, i32
  }
  func.func @transform_3(%arg0: i32, %arg1: i32, %arg2: i32, %arg3: i32) -> (i32, i32, i32) {
    %c0_i32 = arith.constant 0 : i32
    return %arg0, %arg1, %arg2 : i32, i32, i32
  }
}

</mosaic_0001>

<bundles_post_ra>
// kernel: tpu_custom_call.1
= control target key start
LH: loop header
LB: loop body
LE: loop exit
PB: predicated region body
PF: predicated region fallthrough
CT: control target
= control target key end

     0   :  { %s874_s12 = smov 0   ;;  %s876_s13 = smov 0   ;;  %s1036_s0 = inlined_call_operand.vmem [shape: bf16[128,32], index: 0, kind: input, shape index: {}]   ;;  %s1037_s1 = inlined_call_operand.vmem [shape: bf16[3,32,32], index: 1, kind: input, shape index: {}]   ;;  %s1038_s2 = inlined_call_operand.vmem [shape: f32[3,1,32], index: 2, kind: input, shape index: {}]   ;;  %s1039_s3 = inlined_call_operand.vmem [shape: bf16[3,128,32], index: 3, kind: output, shape index: {}]  }
   0x1   :  { %s878_s14 = smov 0  }
   0x2 LB: > { %s39_s15 = sadd.s32 1, %s847_s13  ;;  %p730_p0 = scmp.ge.s32.totalorder %s851_s14, 1  ;;  %s851_s14 = sphi %s878_s14, %s13_s14   ;;  %s847_s13 = sphi %s876_s13, %s1041_s13   ;;  %s843_s12 = sphi %s874_s12, %s1040_s12  }
   0x3   : > { %p41_p1 = scmp.ge.s32.totalorder %s39_s15, 3  ;;  %p208_p2 = scmp.lt.s32.totalorder %s851_s14, 4 }
   0x5   : > { %s1043_s15 = smov (%p41_p1, %s39_s15), 0  ;;  %p209_p3 = pnand %p730_p0, %p208_p2 }
   0x6   : > { %p270_p4 = scmp.lt.s32.totalorder (!%p209_p3), %s843_s12, 2 }
   0x7   : > { %212 = sbr.rel (%p209_p3) target bundleno = 196 (0xc4), region = 32 }
   0xc   : > { %vm306_vm0 = vcmask 261120   ;;  %v853_v0 = vmov 0.0   ;;  %s1045_s12 = smov (!%p270_p4, %s843_s12), 2  ;;  %v787_v3 = vld [vmem:[%s1036_s0] sm:$0xff]  ;;  %v789_v4 = vld [vmem:[%s1036_s0 + $0x10] sm:$0xff]  ;;  %v788_v7 = vld [vmem:[%s1036_s0 + $0x8] sm:$0xff] }
   0xd   : > { %307 = vst.msk [vmem:[#allocation2] sm:$0xff] %vm306_vm0, %v853_v0  ;;  %s785_s16 = sshll.u32 %s1045_s12, 4  ;;  %s287_s19 = scalar_lea.vmem %s1038_s2, %s1045_s12  ;;  %v791_v5 = vld [vmem:[%s1036_s0 + $0x20] sm:$0xff]  ;;  %v793_v6 = vld [vmem:[%s1036_s0 + $0x30] sm:$0xff]  ;;  %v790_v8 = vld [vmem:[%s1036_s0 + $0x18] sm:$0xff]  ;;  %vm572_vm1 = vcmask 257024  }
   0xe   : > { %308 = vst.msk [vmem:[#allocation2 + $0x8] sm:$0xff] %vm306_vm0, %v853_v0  ;;  %s280_s22 = scalar_lea.vmem %s1037_s1, %s785_s16  ;;  %v792_v9 = vld [vmem:[%s1036_s0 + $0x28] sm:$0xff]  ;;  %v794_v10 = vld [vmem:[%s1036_s0 + $0x38] sm:$0xff]  ;;  %v957_v21 = vld [vmem:[%s287_s19] ss:$0 sm:$0xff]  ;;  %s786_s18 = sshll.u32 %s1045_s12, 6 }
   0xf   : > { %309 = vst.msk [vmem:[#allocation2 + $0x10] sm:$0xff] %vm306_vm0, %v853_v0  ;;  %v796_v1 = vld [vmem:[%s280_s22 + $0x8] sm:$0xff]  ;;  %v795_v2 = vld [vmem:[%s280_s22] sm:$0xff]  ;;  %s966_s21 = scalar_lea.vmem %s1039_s3, %s786_s18 }
  0x10   : > { %310 = vst.msk [vmem:[#allocation2 + $0x18] sm:$0xff] %vm306_vm0, %v853_v0  ;;  %442 = vmatpush.bf16.msra.mxu0 %v796_v1  ;;  %797 = vmatpush.bf16.msra.mxu1 %v796_v1 }
  0x11   : > { %311 = vst.msk [vmem:[#allocation2 + $0x20] sm:$0xff] %vm306_vm0, %v853_v0  ;;  %798 = vmatpush.bf16.msra.mxu2 %v796_v1  ;;  %799 = vmatpush.bf16.msra.mxu3 %v796_v1 }
  0x12   : > { %312 = vst.msk [vmem:[#allocation2 + $0x28] sm:$0xff] %vm306_vm0, %v853_v0 }
  0x13   : > { %313 = vst.msk [vmem:[#allocation2 + $0x30] sm:$0xff] %vm306_vm0, %v853_v0 }
  0x14   : > { %314 = vst.msk [vmem:[#allocation2 + $0x38] sm:$0xff] %vm306_vm0, %v853_v0  ;;  %443 = vmatpush.bf16.msra.mxu0 %v795_v2  ;;  %800 = vmatpush.bf16.msra.mxu1 %v795_v2  ;;  %v323_v11 = vld [vmem:[#allocation2] sm:$0xff] }
  0x15   : > { %315 = vst.msk [vmem:[#allocation2 + $0x40] sm:$0xff] %vm306_vm0, %v853_v0  ;;  %801 = vmatpush.bf16.msra.mxu2 %v795_v2  ;;  %802 = vmatpush.bf16.msra.mxu3 %v795_v2  ;;  %v324_v19 = vld [vmem:[#allocation2 + $0x8] sm:$0xff] }
  0x16   : > { %316 = vst.msk [vmem:[#allocation2 + $0x48] sm:$0xff] %vm306_vm0, %v853_v0  ;;  %v325_v38 = vld [vmem:[#allocation2 + $0x10] sm:$0xff] }
  0x17   : > { %317 = vst.msk [vmem:[#allocation2 + $0x50] sm:$0xff] %vm306_vm0, %v853_v0  ;;  %775 = vmatmul.msk.bf16.vlgmr.msra.gmra.mxu0 %vm306_vm0, %v787_v3  ;;  %777 = vmatmul.msk.bf16.vlgmr.msra.gmra.mxu1 %vm306_vm0, %v789_v4  ;;  %v326_v61 = vld [vmem:[#allocation2 + $0x18] sm:$0xff] }
  0x18   : > { %318 = vst.msk [vmem:[#allocation2 + $0x58] sm:$0xff] %vm306_vm0, %v853_v0  ;;  %779 = vmatmul.msk.bf16.vlgmr.msra.gmra.mxu2 %vm306_vm0, %v791_v5  ;;  %781 = vmatmul.msk.bf16.vlgmr.msra.gmra.mxu3 %vm306_vm0, %v793_v6  ;;  %v327_v12 = vld [vmem:[#allocation2 + $0x20] sm:$0xff] }
  0x19   : > { %319 = vst.msk [vmem:[#allocation2 + $0x60] sm:$0xff] %vm306_vm0, %v853_v0  ;;  %v328_v20 = vld [vmem:[#allocation2 + $0x28] sm:$0xff] }
  0x1a   : > { %320 = vst.msk [vmem:[#allocation2 + $0x68] sm:$0xff] %vm306_vm0, %v853_v0  ;;  %v329_v39 = vld [vmem:[#allocation2 + $0x30] sm:$0xff] }
  0x1b   : > { %321 = vst.msk [vmem:[#allocation2 + $0x70] sm:$0xff] %vm306_vm0, %v853_v0  ;;  %v330_v62 = vld [vmem:[#allocation2 + $0x38] sm:$0xff] }
  0x1c   : > { %322 = vst.msk [vmem:[#allocation2 + $0x78] sm:$0xff] %vm306_vm0, %v853_v0  ;;  %v331_v17 = vld [vmem:[#allocation2 + $0x40] sm:$0xff] }
  0x1d   : > { %v332_v35 = vld [vmem:[#allocation2 + $0x48] sm:$0xff] }
  0x1e   : > { %v333_v58 = vld [vmem:[#allocation2 + $0x50] sm:$0xff] }
  0x20   : > { %v335_v18 = vld [vmem:[#allocation2 + $0x60] sm:$0xff] }
  0x21   : > { %v336_v36 = vld [vmem:[#allocation2 + $0x68] sm:$0xff] }
  0x22   : > { %v337_v59 = vld [vmem:[#allocation2 + $0x70] sm:$0xff] }
  0x27   : > { %776 = vmatmul.msk.bf16.gmra.mxu0 %vm306_vm0, %v788_v7  ;;  %778 = vmatmul.msk.bf16.gmra.mxu1 %vm306_vm0, %v790_v8 }
  0x28   : > { %780 = vmatmul.msk.bf16.gmra.mxu2 %vm306_vm0, %v792_v9  ;;  %782 = vmatmul.msk.bf16.gmra.mxu3 %vm306_vm0, %v794_v10 }
  0x94   : > { %v445_v13 = vpop.f32.mrf.mxu0  ;;  %v455_v14 = vpop.f32.mrf.mxu1 }
  0x95   : > { %v485_v15 = vadd.f32 %v445_v13, %v323_v11  ;;  %v489_v16 = vadd.f32 %v455_v14, %v327_v12 }
  0x97   : > { %501 = vst.msk [vmem:[#allocation2] sm:$0xff] %vm306_vm0, %v485_v15 }
  0x98   : > { %505 = vst.msk [vmem:[#allocation2 + $0x20] sm:$0xff] %vm306_vm0, %v489_v16 }
  0x9b   : > { %v465_v22 = vpop.f32.mrf.mxu2  ;;  %v475_v23 = vpop.f32.mrf.mxu3 }
  0x9c   : > { %v493_v24 = vadd.f32 %v465_v22, %v331_v17  ;;  %v497_v25 = vadd.f32 %v475_v23, %v335_v18  ;;  %v447_v26 = vpop.f32.mrf.mxu0  ;;  %v457_v27 = vpop.f32.mrf.mxu1  ;;  %v334_v18 = vld [vmem:[#allocation2 + $0x58] sm:$0xff] }
  0x9d   : > { %v486_v28 = vadd.f32 %v447_v26, %v324_v19  ;;  %v490_v29 = vadd.f32 %v457_v27, %v328_v20  ;;  %v338_v19 = vld [vmem:[#allocation2 + $0x78] sm:$0xff] }
  0x9e   : > { %v520_v30 = vld [vmem:[#allocation2] sm:$0xff]  ;;  %509 = vst.msk [vmem:[#allocation2 + $0x40] sm:$0xff] %vm306_vm0, %v493_v24 }
  0x9f   : > { %v540_v31 = vadd.f32 %v957_v21, %v520_v30  ;;  %v524_v32 = vld [vmem:[#allocation2 + $0x20] sm:$0xff]  ;;  %513 = vst.msk [vmem:[#allocation2 + $0x60] sm:$0xff] %vm306_vm0, %v497_v25 }
  0xa0   : > { %v544_v33 = vadd.f32 %v957_v21, %v524_v32  ;;  %502 = vst.msk [vmem:[#allocation2 + $0x8] sm:$0xff] %vm306_vm0, %v486_v28 }
  0xa1   : > { %v556_v34 = vpack.c.bf16 %v540_v31, %v540_v31  ;;  %506 = vst.msk [vmem:[#allocation2 + $0x28] sm:$0xff] %vm306_vm0, %v490_v29 }
  0xa2   : > { %v560_v37 = vpack.c.bf16 %v544_v33, %v544_v33 }
  0xa3   : > { %573 = vst.msk [vmem:[%s966_s21] sm:$0xf] %vm572_vm1, %v556_v34  ;;  %v467_v40 = vpop.f32.mrf.mxu2  ;;  %v477_v41 = vpop.f32.mrf.mxu3 }
  0xa4   : > { %577 = vst.msk [vmem:[%s966_s21 + $0x10] sm:$0xf] %vm572_vm1, %v560_v37  ;;  %v494_v42 = vadd.f32 %v467_v40, %v332_v35  ;;  %v498_v43 = vadd.f32 %v477_v41, %v336_v36  ;;  %v450_v44 = vpop.f32.mrf.mxu0  ;;  %v460_v45 = vpop.f32.mrf.mxu1 }
  0xa5   : > { %v528_v46 = vld [vmem:[#allocation2 + $0x40] sm:$0xff]  ;;  %v487_v47 = vadd.f32 %v450_v44, %v325_v38  ;;  %v491_v48 = vadd.f32 %v460_v45, %v329_v39 }
  0xa6   : > { %v548_v49 = vadd.f32 %v957_v21, %v528_v46  ;;  %v532_v50 = vld [vmem:[#allocation2 + $0x60] sm:$0xff]  ;;  %510 = vst.msk [vmem:[#allocation2 + $0x48] sm:$0xff] %vm306_vm0, %v494_v42 }
  0xa7   : > { %v552_v51 = vadd.f32 %v957_v21, %v532_v50  ;;  %v521_v52 = vld [vmem:[#allocation2 + $0x8] sm:$0xff]  ;;  %514 = vst.msk [vmem:[#allocation2 + $0x68] sm:$0xff] %vm306_vm0, %v498_v43 }
  0xa8   : > { %v564_v53 = vpack.c.bf16 %v548_v49, %v548_v49  ;;  %v541_v54 = vadd.f32 %v957_v21, %v521_v52  ;;  %v525_v55 = vld [vmem:[#allocation2 + $0x28] sm:$0xff]  ;;  %503 = vst.msk [vmem:[#allocation2 + $0x10] sm:$0xff] %vm306_vm0, %v487_v47 }
  0xa9   : > { %v568_v56 = vpack.c.bf16 %v552_v51, %v552_v51  ;;  %v545_v57 = vadd.f32 %v957_v21, %v525_v55  ;;  %507 = vst.msk [vmem:[#allocation2 + $0x30] sm:$0xff] %vm306_vm0, %v491_v48 }
  0xaa   : > { %581 = vst.msk [vmem:[%s966_s21 + $0x20] sm:$0xf] %vm572_vm1, %v564_v53  ;;  %v557_v60 = vpack.c.bf16 %v541_v54, %v541_v54 }
  0xab   : > { %585 = vst.msk [vmem:[%s966_s21 + $0x30] sm:$0xf] %vm572_vm1, %v568_v56  ;;  %v561_v63 = vpack.c.bf16 %v545_v57, %v545_v57  ;;  %v470_v0 = vpop.f32.mrf.mxu2  ;;  %v480_v1 = vpop.f32.mrf.mxu3 }
  0xac   : > { %574 = vst.msk [vmem:[%s966_s21 + $0x4] sm:$0xf] %vm572_vm1, %v557_v60  ;;  %v495_v2 = vadd.f32 %v470_v0, %v333_v58  ;;  %v499_v3 = vadd.f32 %v480_v1, %v337_v59  ;;  %v452_v4 = vpop.f32.mrf.mxu0  ;;  %v462_v5 = vpop.f32.mrf.mxu1 }
  0xad   : > { %578 = vst.msk [vmem:[%s966_s21 + $0x14] sm:$0xf] %vm572_vm1, %v561_v63  ;;  %v529_v6 = vld [vmem:[#allocation2 + $0x48] sm:$0xff]  ;;  %v488_v7 = vadd.f32 %v452_v4, %v326_v61  ;;  %v492_v8 = vadd.f32 %v462_v5, %v330_v62 }
  0xae   : > { %v549_v9 = vadd.f32 %v957_v21, %v529_v6  ;;  %v533_v10 = vld [vmem:[#allocation2 + $0x68] sm:$0xff]  ;;  %511 = vst.msk [vmem:[#allocation2 + $0x50] sm:$0xff] %vm306_vm0, %v495_v2 }
  0xaf   : > { %v553_v11 = vadd.f32 %v957_v21, %v533_v10  ;;  %v522_v12 = vld [vmem:[#allocation2 + $0x10] sm:$0xff]  ;;  %515 = vst.msk [vmem:[#allocation2 + $0x70] sm:$0xff] %vm306_vm0, %v499_v3 }
  0xb0   : > { %v565_v13 = vpack.c.bf16 %v549_v9, %v549_v9  ;;  %v542_v14 = vadd.f32 %v957_v21, %v522_v12  ;;  %v526_v15 = vld [vmem:[#allocation2 + $0x30] sm:$0xff]  ;;  %504 = vst.msk [vmem:[#allocation2 + $0x18] sm:$0xff] %vm306_vm0, %v488_v7 }
  0xb1   : > { %v569_v16 = vpack.c.bf16 %v553_v11, %v553_v11  ;;  %v546_v17 = vadd.f32 %v957_v21, %v526_v15  ;;  %508 = vst.msk [vmem:[#allocation2 + $0x38] sm:$0xff] %vm306_vm0, %v492_v8 }
  0xb2   : > { %582 = vst.msk [vmem:[%s966_s21 + $0x24] sm:$0xf] %vm572_vm1, %v565_v13  ;;  %v558_v20 = vpack.c.bf16 %v542_v14, %v542_v14 }
  0xb3   : > { %586 = vst.msk [vmem:[%s966_s21 + $0x34] sm:$0xf] %vm572_vm1, %v569_v16  ;;  %v562_v22 = vpack.c.bf16 %v546_v17, %v546_v17  ;;  %v472_v23 = vpop.f32.mrf.mxu2  ;;  %v482_v24 = vpop.f32.mrf.mxu3 }
  0xb4   : > { %575 = vst.msk [vmem:[%s966_s21 + $0x8] sm:$0xf] %vm572_vm1, %v558_v20  ;;  %v496_v25 = vadd.f32 %v472_v23, %v334_v18  ;;  %v500_v26 = vadd.f32 %v482_v24, %v338_v19 }
  0xb5   : > { %579 = vst.msk [vmem:[%s966_s21 + $0x18] sm:$0xf] %vm572_vm1, %v562_v22  ;;  %v530_v27 = vld [vmem:[#allocation2 + $0x50] sm:$0xff] }
  0xb6   : > { %v550_v28 = vadd.f32 %v957_v21, %v530_v27  ;;  %v534_v29 = vld [vmem:[#allocation2 + $0x70] sm:$0xff]  ;;  %512 = vst.msk [vmem:[#allocation2 + $0x58] sm:$0xff] %vm306_vm0, %v496_v25 }
  0xb7   : > { %v554_v30 = vadd.f32 %v957_v21, %v534_v29  ;;  %v523_v31 = vld [vmem:[#allocation2 + $0x18] sm:$0xff]  ;;  %516 = vst.msk [vmem:[#allocation2 + $0x78] sm:$0xff] %vm306_vm0, %v500_v26 }
  0xb8   : > { %v566_v32 = vpack.c.bf16 %v550_v28, %v550_v28  ;;  %v543_v33 = vadd.f32 %v957_v21, %v523_v31  ;;  %v527_v34 = vld [vmem:[#allocation2 + $0x38] sm:$0xff] }
  0xb9   : > { %v570_v35 = vpack.c.bf16 %v554_v30, %v554_v30  ;;  %v547_v36 = vadd.f32 %v957_v21, %v527_v34 }
  0xba   : > { %583 = vst.msk [vmem:[%s966_s21 + $0x28] sm:$0xf] %vm572_vm1, %v566_v32  ;;  %v559_v37 = vpack.c.bf16 %v543_v33, %v543_v33 }
  0xbb   : > { %587 = vst.msk [vmem:[%s966_s21 + $0x38] sm:$0xf] %vm572_vm1, %v570_v35  ;;  %v563_v38 = vpack.c.bf16 %v547_v36, %v547_v36 }
  0xbc   : > { %576 = vst.msk [vmem:[%s966_s21 + $0xc] sm:$0xf] %vm572_vm1, %v559_v37 }
  0xbd   : > { %580 = vst.msk [vmem:[%s966_s21 + $0x1c] sm:$0xf] %vm572_vm1, %v563_v38  ;;  %v531_v39 = vld [vmem:[#allocation2 + $0x58] sm:$0xff] }
  0xbe   : > { %v551_v40 = vadd.f32 %v957_v21, %v531_v39  ;;  %v535_v41 = vld [vmem:[#allocation2 + $0x78] sm:$0xff] }
  0xbf   : > { %v555_v42 = vadd.f32 %v957_v21, %v535_v41 }
  0xc0   : > { %v567_v43 = vpack.c.bf16 %v551_v40, %v551_v40 }
  0xc1   : > { %v571_v44 = vpack.c.bf16 %v555_v42, %v555_v42 }
  0xc2   : > { %584 = vst.msk [vmem:[%s966_s21 + $0x2c] sm:$0xf] %vm572_vm1, %v567_v43 }
  0xc3   : > { %588 = vst.msk [vmem:[%s966_s21 + $0x3c] sm:$0xf] %vm572_vm1, %v571_v44 }
  0xc4 PF: > { %s13_s14 = sadd.s32 1, %s851_s14   ;;  %s1040_s12 = smov %s847_s13 }
  0xc5   : > { %p10_p5 = scmp.ge.s32.totalorder %s13_s14, 5   ;;  %s1041_s13 = smov %s1043_s15 }
  0xc7   :  { %12 = sbr.rel (!%p10_p5) target bundleno = 2 (0x2), region = 76 }

</bundles_post_ra>
